<compile_context>
chip_gen: v7x
topology: tpu7x:2x2x1
jax: 0.10.0
libtpu: 0.0.40
codegen_flags: <defaults>
</compile_context>

<pallas_src>
import functools

import jax
import jax.numpy as jnp
from jax.experimental import pallas as pl
from jax.experimental.pallas import tpu as pltpu


def _round_up(n, m):
    return (n + m - 1) // m * m


def _pick_sub_block(tc, target=128):
    """Largest multiple of 8 that is <= target and divides tc (tc % 8 == 0)."""
    sb = min(target, tc)
    while tc % sb:
        sb -= 8
    return max(sb, 8)


def mingru_kernel(x_ref, w1_ref, w2_ref, ii_ref, h0_ref,      # inputs
                  out_ref, hn_ref,                            # outputs
                  hcarry_ref,                                 # VMEM scratch
                  *, sub_block, last_row):
    """Grid = (batch, time_chunk). One step processes a (Tc, *) tile."""
    tc = x_ref.shape[1]          # time-chunk length (multiple of sub_block)
    hp = w2_ref.shape[0]         # padded hidden width (multiple of 128)
    chunk = pl.program_id(1)
    n_sub = tc // sub_block
    last_sub = last_row // sub_block          # static
    last_in_sub = last_row % sub_block        # static

    h0 = h0_ref[0]                                              # (1, Hp) f32

    # Recurrence carry entering this chunk; reset to h0 at the first chunk.
    @pl.when(chunk == 0)
    def _():
        hcarry_ref[...] = h0

    # (SB, 1) row index, broadcast in the compares (no (SB,Hp) int32 tile).
    row = jax.lax.broadcasted_iota(jnp.int32, (sub_block, 1), 0)

    def body(s, h_prev):
        off = s * sub_block
        if not isinstance(off, int):
            off = pl.multiple_of(off, sub_block)

        # --- fused input projection (bf16 MXU, f32 accumulate) ---
        x_s = x_ref[0, pl.ds(off, sub_block), :]                # (SB, Din) bf16
        hg = jnp.dot(x_s, w1_ref[...],
                     preferred_element_type=jnp.float32)        # (SB, 2Hp) f32
        hid = hg[:, :hp]                                        # tile-aligned slice
        g = jax.nn.sigmoid(hg[:, hp:])
        ii = (ii_ref[0, pl.ds(off, sub_block), :] != 0.0).astype(jnp.float32)

        # Linear recurrence h_t = a_t*h_{t-1} + c_t with the is_init reset
        # folded into the coefficients (reset => a_t = 0, inject (1-g)*h0).
        one_m_g = 1.0 - g
        A = one_m_g * (1.0 - ii)                                # (SB, Hp)
        C = one_m_g * ii * h0 + g * hid                         # (SB, Hp)

        # --- Hillis–Steele inclusive scan over the sub-block (time axis) ---
        # (A1,C1) o (A2,C2) = (A2*A1, A2*C1 + C2); identity = (1, 0).
        d = 1
        while d < sub_block:                  # static: ceil(log2(SB)) passes
            keep = row >= d                                     # (SB, 1)
            A_prev = jnp.where(keep, pltpu.roll(A, shift=d, axis=0), 1.0)
            C_prev = jnp.where(keep, pltpu.roll(C, shift=d, axis=0), 0.0)
            A, C = A * A_prev, A * C_prev + C
            d *= 2

        h_blk = A * h_prev + C                                  # (SB, Hp) f32

        # --- output projection for this sub-block (bf16 MXU) ---
        out_ref[0, pl.ds(off, sub_block), :] = jnp.dot(
            h_blk.astype(w2_ref.dtype), w2_ref[...],
            preferred_element_type=jnp.float32)

        # Final hidden state h[:, T-1]; written every chunk, last chunk wins
        # (row index accounts for a zero-padded time tail in the last chunk).
        @pl.when(s == last_sub)
        def _():
            hn_ref[0] = h_blk[last_in_sub:last_in_sub + 1, :]

        return h_blk[sub_block - 1:sub_block, :]

    h_last = jax.lax.fori_loop(0, n_sub, body, hcarry_ref[...], unroll=True)
    hcarry_ref[...] = h_last        # carry into the next time chunk


def mingru_forward(x, w1, w2, is_init, h_0=None, *, time_chunk=256,
                   sub_block=128):
    """x: (B,T,Din); w1: (Din,2H); w2: (H,Dout); is_init: (B,T,1); h_0: (B,1,H)."""
    B, T, Din = x.shape
    H = w1.shape[1] // 2
    Dout = w2.shape[1]
    if h_0 is None:
        h_0 = jnp.zeros((B, 1, H), jnp.float32)

    Hp = _round_up(H, 128)
    Op = _round_up(Dout, 128)
    Tc = _round_up(min(time_chunk, T), 8)
    Tp = _round_up(T, Tc)
    n_chunks = Tp // Tc
    sb = _pick_sub_block(Tc, sub_block)

    # bf16 operands for the MXU; padding only where actually required.
    xp = x.astype(jnp.bfloat16)
    iip = is_init.astype(jnp.float32)
    if Tp != T:
        xp = jnp.pad(xp, ((0, 0), (0, Tp - T), (0, 0)))
        iip = jnp.pad(iip, ((0, 0), (0, Tp - T), (0, 0)))
    h0p = h_0.astype(jnp.float32)
    if Hp != H:
        h0p = jnp.pad(h0p, ((0, 0), (0, 0), (0, Hp - H)))
    w1h = w1[:, :H].astype(jnp.bfloat16)
    w1g = w1[:, H:].astype(jnp.bfloat16)
    if Hp != H:
        w1h = jnp.pad(w1h, ((0, 0), (0, Hp - H)))
        w1g = jnp.pad(w1g, ((0, 0), (0, Hp - H)))
    w1f = jnp.concatenate([w1h, w1g], axis=1)                 # (Din, 2*Hp)
    w2p = w2.astype(jnp.bfloat16)
    if Hp != H or Op != Dout:
        w2p = jnp.pad(w2p, ((0, Hp - H), (0, Op - Dout)))      # (Hp, Op)

    def _weight_spec(shape):
        idx_map = lambda b, c: (0,) * len(shape)
        try:  # single-buffer the constant weights (fetched once)
            return pl.BlockSpec(shape, idx_map, pipeline_mode=pl.Buffered(1))
        except TypeError:
            return pl.BlockSpec(shape, idx_map)

    # VMEM budget: double-buffered I/O tiles + single-buffered weights + live
    # scan values; clamp to [32 MiB, 56 MiB] (headroom under v7x 64 MiB).
    est = (2 * Tc * Din * 2 + 2 * Tc * 4 + 4 * Hp * 4 + 2 * Tc * Op * 4
           + Din * 2 * Hp * 2 + Hp * Op * 2 + Hp * 4
           + 10 * sb * Hp * 4 + sb * 2 * Hp * 4)
    vmem_limit = int(min(max(2 * est, 32 << 20), 56 << 20))

    grid_spec = pltpu.PrefetchScalarGridSpec(
        num_scalar_prefetch=0,
        grid=(B, n_chunks),
        in_specs=[
            pl.BlockSpec((1, Tc, Din), lambda b, c: (b, c, 0)),   # x (bf16)
            _weight_spec((Din, 2 * Hp)),                          # W_hg fused
            _weight_spec((Hp, Op)),                               # W_out
            pl.BlockSpec((1, Tc, 1), lambda b, c: (b, c, 0)),     # is_init
            pl.BlockSpec((1, 1, Hp), lambda b, c: (b, 0, 0)),     # h_0
        ],
        out_specs=[
            pl.BlockSpec((1, Tc, Op), lambda b, c: (b, c, 0)),    # out
            pl.BlockSpec((1, 1, Hp), lambda b, c: (b, 0, 0)),     # h_n
        ],
        scratch_shapes=[pltpu.VMEM((1, Hp), jnp.float32)],        # h carry
    )

    out_p, hn_p = pl.pallas_call(
        functools.partial(mingru_kernel, sub_block=sb,
                          last_row=(T - 1) % Tc),
        grid_spec=grid_spec,
        out_shape=(
            jax.ShapeDtypeStruct((B, Tp, Op), jnp.float32),
            jax.ShapeDtypeStruct((B, 1, Hp), jnp.float32),
        ),
        compiler_params=pltpu.CompilerParams(
            dimension_semantics=("parallel", "arbitrary"),
            vmem_limit_bytes=vmem_limit),
    )(xp, w1f, w2p, iip, h0p)

    out = out_p if (Tp == T and Op == Dout) else out_p[:, :T, :Dout]
    hn = hn_p if Hp == H else hn_p[:, :, :H]
    return out, hn


def mingru_reference(x, w1, w2, is_init, h_0):
    """Pure-JAX sequential fold with the kernel's bf16 operand rounding."""
    H = w2.shape[0]
    xb = x.astype(jnp.bfloat16).astype(jnp.float32)
    w1b = w1.astype(jnp.bfloat16).astype(jnp.float32)
    w2b = w2.astype(jnp.bfloat16).astype(jnp.float32)
    hg = xb @ w1b
    hidden = hg[..., :H]
    gate = jax.nn.sigmoid(hg[..., H:])
    B, T, _ = x.shape
    h_prev = h_0[:, 0]
    hs = []
    for t in range(T):
        prev = jnp.where(is_init[:, t] != 0.0, h_0[:, 0], h_prev)
        h_prev = (1.0 - gate[:, t]) * prev + gate[:, t] * hidden[:, t]
        hs.append(h_prev)
    h_seq = jnp.stack(hs, axis=1)
    out = h_seq.astype(jnp.bfloat16).astype(jnp.float32) @ w2b
    return out, h_seq[:, -1:]


if __name__ == "__main__":
    B, T, INPUT_DIM, HIDDEN_DIM, OUTPUT_DIM = 2, 16, 4, 32, 8

    key = jax.random.PRNGKey(0)
    kx, kw1, kw2, kh0 = jax.random.split(key, 4)

    # nn.Linear weights, stored transposed for x @ W.
    w1 = (jax.random.uniform(kw1, (INPUT_DIM, 2 * HIDDEN_DIM), jnp.float32)
          - 0.5) * (2.0 / jnp.sqrt(INPUT_DIM))
    w2 = (jax.random.uniform(kw2, (HIDDEN_DIM, OUTPUT_DIM), jnp.float32)
          - 0.5) * (2.0 / jnp.sqrt(HIDDEN_DIM))

    x = jax.random.normal(kx, (B, T, INPUT_DIM), jnp.float32)
    h_0 = jax.random.normal(kh0, (B, 1, HIDDEN_DIM), jnp.float32)

    # Episode-start flags, including mid-sequence resets in both time chunks
    # and one reset exactly on a chunk boundary.
    is_init = jnp.zeros((B, T, 1), jnp.float32)
    is_init = is_init.at[:, 0, 0].set(1.0)
    is_init = is_init.at[1, 5, 0].set(1.0)    # reset inside chunk 0
    is_init = is_init.at[0, 8, 0].set(1.0)    # reset at the chunk boundary
    is_init = is_init.at[0, 11, 0].set(1.0)   # reset inside chunk 1

    # Case 1: time_chunk=8 -> 2 chunks; exercises the cross-chunk carry.
    out, h_n = jax.block_until_ready(
        mingru_forward(x, w1, w2, is_init, h_0, time_chunk=8))
    out_ref, h_n_ref = mingru_reference(x, w1, w2, is_init, h_0)
    assert out.shape == (B, T, OUTPUT_DIM) and h_n.shape == (B, 1, HIDDEN_DIM)
    assert jnp.allclose(out, out_ref, atol=5e-3, rtol=5e-3), float(
        jnp.max(jnp.abs(out - out_ref)))
    assert jnp.allclose(h_n, h_n_ref, atol=5e-3, rtol=5e-3)

    # Case 2: ragged T (13) -> exercises the padded time tail + h_n row pick.
    T2 = 13
    x2 = x[:, :T2]
    ii2 = is_init[:, :T2]
    out2, h_n2 = jax.block_until_ready(
        mingru_forward(x2, w1, w2, ii2, h_0))
    out2_ref, h_n2_ref = mingru_reference(x2, w1, w2, ii2, h_0)
    assert out2.shape == (B, T2, OUTPUT_DIM)
    assert jnp.allclose(out2, out2_ref, atol=5e-3, rtol=5e-3)
    assert jnp.allclose(h_n2, h_n2_ref, atol=5e-3, rtol=5e-3)

    print("KERNEL_OK")
</pallas_src>

<mosaic_0001>
module attributes {stable_mosaic.version = 11 : i64} {
  func.func @mingru_kernel(%arg0: i32, %arg1: i32, %arg2: memref<1x8x4xbf16, #tpu.memory_space<vmem>>, %arg3: memref<4x256xbf16, #tpu.memory_space<vmem>>, %arg4: memref<128x128xbf16, #tpu.memory_space<vmem>>, %arg5: memref<1x8x1xf32, #tpu.memory_space<vmem>>, %arg6: memref<1x1x128xf32, #tpu.memory_space<vmem>>, %arg7: memref<1x8x128xf32, #tpu.memory_space<vmem>>, %arg8: memref<1x1x128xf32, #tpu.memory_space<vmem>>, %arg9: memref<1x128xf32, #tpu.memory_space<vmem>>) attributes {dimension_semantics = [#tpu.dimension_semantics<parallel>, #tpu.dimension_semantics<arbitrary>], iteration_bounds = array<i64: 2, 2>, scalar_prefetch = 0 : i64, scratch_operands = 1 : i64, tpu.core_type = #tpu.core_type<tc>, window_params = [{transform_indices = @transform_0, window_bounds = array<i64: 1, 8, 4>}, {pipeline_mode = #tpu.pipeline_mode<synchronous>, transform_indices = @transform_1, window_bounds = array<i64: 4, 256>}, {pipeline_mode = #tpu.pipeline_mode<synchronous>, transform_indices = @transform_2, window_bounds = array<i64: 128, 128>}, {transform_indices = @transform_3, window_bounds = array<i64: 1, 8, 1>}, {transform_indices = @transform_4, window_bounds = array<i64: 1, 1, 128>}, {transform_indices = @transform_5, window_bounds = array<i64: 1, 8, 128>}, {transform_indices = @transform_6, window_bounds = array<i64: 1, 1, 128>}]} {
    %c0 = arith.constant 0 : index
    %c0_0 = arith.constant 0 : index
    %c0_1 = arith.constant 0 : index
    %0 = vector.load %arg6[%c0, %c0_0, %c0_1] : memref<1x1x128xf32, #tpu.memory_space<vmem>>, vector<1x1x128xf32>
    %1 = vector.shape_cast %0 : vector<1x1x128xf32> to vector<1x128xf32>
    %c0_i32 = arith.constant 0 : i32
    %2 = arith.cmpi eq, %arg1, %c0_i32 : i32
    %3 = arith.extui %2 : i1 to i32
    %c0_i32_2 = arith.constant 0 : i32
    %4 = arith.cmpi ne, %3, %c0_i32_2 : i32
    scf.if %4 {
      %c0_38 = arith.constant 0 : index
      %c0_39 = arith.constant 0 : index
      %100 = vector.load %arg9[%c0_38, %c0_39] : memref<1x128xf32, #tpu.memory_space<vmem>>, vector<1x128xf32>
      tpu.vector_store %arg9[%c0_38, %c0_39], %1 {strides = array<i32>} : memref<1x128xf32, #tpu.memory_space<vmem>>, vector<1x128xf32>,
    } else {
    }
    %5 = tpu.iota {dimensions = array<i32: 0>} : vector<8x1xi32>
    %c0_3 = arith.constant 0 : index
    %c0_4 = arith.constant 0 : index
    %6 = vector.load %arg9[%c0_3, %c0_4] : memref<1x128xf32, #tpu.memory_space<vmem>>, vector<1x128xf32>
    %c0_i32_5 = arith.constant 0 : i32
    %c8_i32 = arith.constant 8 : i32
    %7 = arith.muli %c0_i32_5, %c8_i32 : i32
    %8 = tpu.assume_multiple %7, 8 : i32
    %c0_6 = arith.constant 0 : index
    %9 = arith.index_cast %8 : i32 to index
    %c0_7 = arith.constant 0 : index
    %10 = vector.load %arg2[%c0_6, %9, %c0_7] : memref<1x8x4xbf16, #tpu.memory_space<vmem>>, vector<1x8x4xbf16>
    %11 = vector.shape_cast %10 : vector<1x8x4xbf16> to vector<8x4xbf16>
    %c0_8 = arith.constant 0 : index
    %c0_9 = arith.constant 0 : index
    %12 = vector.load %arg3[%c0_8, %c0_9] : memref<4x256xbf16, #tpu.memory_space<vmem>>, vector<4x256xbf16>
    %cst = arith.constant dense<0.000000e+00> : vector<8x256xf32>
    %13 = tpu.matmul %11, %12, %cst {dimension_numbers = #tpu.dot_dimension_numbers<[1], [0], [0], [1], [0, 0, 1, 1], [], []>} : vector<8x4xbf16>, vector<4x256xbf16>, vector<8x256xf32> -> vector<8x256xf32>
    %14 = vector.extract_strided_slice %13 {offsets = [0, 0], sizes = [8, 128], strides = [1, 1]} : vector<8x256xf32> to vector<8x128xf32>
    %15 = vector.extract_strided_slice %13 {offsets = [0, 128], sizes = [8, 128], strides = [1, 1]} : vector<8x256xf32> to vector<8x128xf32>
    %16 = arith.negf %15 : vector<8x128xf32>
    %17 = math.exp %16 : vector<8x128xf32>
    %cst_10 = arith.constant 1.000000e+00 : f32
    %18 = vector.broadcast %cst_10 : f32 to vector<8x128xf32>
    %19 = arith.addf %18, %17 : vector<8x128xf32>
    %20 = arith.divf %18, %19 : vector<8x128xf32>
    %c0_11 = arith.constant 0 : index
    %21 = arith.index_cast %8 : i32 to index
    %c0_12 = arith.constant 0 : index
    %22 = vector.load %arg5[%c0_11, %21, %c0_12] : memref<1x8x1xf32, #tpu.memory_space<vmem>>, vector<1x8x1xf32>
    %23 = vector.shape_cast %22 : vector<1x8x1xf32> to vector<8x1xf32>
    %cst_13 = arith.constant 0.000000e+00 : f32
    %24 = vector.broadcast %cst_13 : f32 to vector<8x1xf32>
    %25 = arith.cmpf one, %23, %24 : vector<8x1xf32>
    %26 = arith.extui %25 : vector<8x1xi1> to vector<8x1xi32>
    %27 = arith.sitofp %26 : vector<8x1xi32> to vector<8x1xf32>
    %cst_14 = arith.constant 1.000000e+00 : f32
    %28 = vector.broadcast %cst_14 : f32 to vector<8x128xf32>
    %29 = arith.subf %28, %20 : vector<8x128xf32>
    %cst_15 = arith.constant 1.000000e+00 : f32
    %30 = vector.broadcast %cst_15 : f32 to vector<8x1xf32>
    %31 = arith.subf %30, %27 : vector<8x1xf32>
    %32 = vector.broadcast %31 : vector<8x1xf32> to vector<8x128xf32>
    %33 = arith.mulf %29, %32 : vector<8x128xf32>
    %34 = vector.broadcast %27 : vector<8x1xf32> to vector<8x128xf32>
    %35 = arith.mulf %29, %34 : vector<8x128xf32>
    %36 = vector.broadcast %1 : vector<1x128xf32> to vector<8x128xf32>
    %37 = arith.mulf %35, %36 : vector<8x128xf32>
    %38 = arith.mulf %20, %14 : vector<8x128xf32>
    %39 = arith.addf %37, %38 : vector<8x128xf32>
    %c1_i32 = arith.constant 1 : i32
    %40 = vector.broadcast %c1_i32 : i32 to vector<8x1xi32>
    %41 = arith.cmpi sge, %5, %40 : vector<8x1xi32>
    %c1_i32_16 = arith.constant 1 : i32
    %42 = tpu.dynamic_rotate %33 by %c1_i32_16 dim 0 : vector<8x128xf32>, i32 -> vector<8x128xf32>
    %cst_17 = arith.constant 1.000000e+00 : f32
    %43 = vector.shape_cast %41 : vector<8x1xi1> to vector<8x1xi1>
    %44 = vector.broadcast %43 : vector<8x1xi1> to vector<8x128xi1>
    %45 = vector.broadcast %cst_17 : f32 to vector<8x128xf32>
    %46 = arith.select %44, %42, %45 : vector<8x128xi1>, vector<8x128xf32>
    %c1_i32_18 = arith.constant 1 : i32
    %47 = tpu.dynamic_rotate %39 by %c1_i32_18 dim 0 : vector<8x128xf32>, i32 -> vector<8x128xf32>
    %cst_19 = arith.constant 0.000000e+00 : f32
    %48 = vector.shape_cast %41 : vector<8x1xi1> to vector<8x1xi1>
    %49 = vector.broadcast %48 : vector<8x1xi1> to vector<8x128xi1>
    %50 = vector.broadcast %cst_19 : f32 to vector<8x128xf32>
    %51 = arith.select %49, %47, %50 : vector<8x128xi1>, vector<8x128xf32>
    %52 = arith.mulf %33, %46 : vector<8x128xf32>
    %53 = arith.mulf %33, %51 : vector<8x128xf32>
    %54 = arith.addf %53, %39 : vector<8x128xf32>
    %c2_i32 = arith.constant 2 : i32
    %55 = vector.broadcast %c2_i32 : i32 to vector<8x1xi32>
    %56 = arith.cmpi sge, %5, %55 : vector<8x1xi32>
    %c2_i32_20 = arith.constant 2 : i32
    %57 = tpu.dynamic_rotate %52 by %c2_i32_20 dim 0 : vector<8x128xf32>, i32 -> vector<8x128xf32>
    %cst_21 = arith.constant 1.000000e+00 : f32
    %58 = vector.shape_cast %56 : vector<8x1xi1> to vector<8x1xi1>
    %59 = vector.broadcast %58 : vector<8x1xi1> to vector<8x128xi1>
    %60 = vector.broadcast %cst_21 : f32 to vector<8x128xf32>
    %61 = arith.select %59, %57, %60 : vector<8x128xi1>, vector<8x128xf32>
    %c2_i32_22 = arith.constant 2 : i32
    %62 = tpu.dynamic_rotate %54 by %c2_i32_22 dim 0 : vector<8x128xf32>, i32 -> vector<8x128xf32>
    %cst_23 = arith.constant 0.000000e+00 : f32
    %63 = vector.shape_cast %56 : vector<8x1xi1> to vector<8x1xi1>
    %64 = vector.broadcast %63 : vector<8x1xi1> to vector<8x128xi1>
    %65 = vector.broadcast %cst_23 : f32 to vector<8x128xf32>
    %66 = arith.select %64, %62, %65 : vector<8x128xi1>, vector<8x128xf32>
    %67 = arith.mulf %52, %61 : vector<8x128xf32>
    %68 = arith.mulf %52, %66 : vector<8x128xf32>
    %69 = arith.addf %68, %54 : vector<8x128xf32>
    %c4_i32 = arith.constant 4 : i32
    %70 = vector.broadcast %c4_i32 : i32 to vector<8x1xi32>
    %71 = arith.cmpi sge, %5, %70 : vector<8x1xi32>
    %c4_i32_24 = arith.constant 4 : i32
    %72 = tpu.dynamic_rotate %67 by %c4_i32_24 dim 0 : vector<8x128xf32>, i32 -> vector<8x128xf32>
    %cst_25 = arith.constant 1.000000e+00 : f32
    %73 = vector.shape_cast %71 : vector<8x1xi1> to vector<8x1xi1>
    %74 = vector.broadcast %73 : vector<8x1xi1> to vector<8x128xi1>
    %75 = vector.broadcast %cst_25 : f32 to vector<8x128xf32>
    %76 = arith.select %74, %72, %75 : vector<8x128xi1>, vector<8x128xf32>
    %c4_i32_26 = arith.constant 4 : i32
    %77 = tpu.dynamic_rotate %69 by %c4_i32_26 dim 0 : vector<8x128xf32>, i32 -> vector<8x128xf32>
    %cst_27 = arith.constant 0.000000e+00 : f32
    %78 = vector.shape_cast %71 : vector<8x1xi1> to vector<8x1xi1>
    %79 = vector.broadcast %78 : vector<8x1xi1> to vector<8x128xi1>
    %80 = vector.broadcast %cst_27 : f32 to vector<8x128xf32>
    %81 = arith.select %79, %77, %80 : vector<8x128xi1>, vector<8x128xf32>
    %82 = arith.mulf %67, %76 : vector<8x128xf32>
    %83 = arith.mulf %67, %81 : vector<8x128xf32>
    %84 = arith.addf %83, %69 : vector<8x128xf32>
    %85 = vector.broadcast %6 : vector<1x128xf32> to vector<8x128xf32>
    %86 = arith.mulf %82, %85 : vector<8x128xf32>
    %87 = arith.addf %86, %84 : vector<8x128xf32>
    %88 = arith.truncf %87 : vector<8x128xf32> to vector<8x128xbf16>
    %c0_28 = arith.constant 0 : index
    %c0_29 = arith.constant 0 : index
    %89 = vector.load %arg4[%c0_28, %c0_29] : memref<128x128xbf16, #tpu.memory_space<vmem>>, vector<128x128xbf16>
    %cst_30 = arith.constant dense<0.000000e+00> : vector<8x128xf32>
    %90 = tpu.matmul %88, %89, %cst_30 {dimension_numbers = #tpu.dot_dimension_numbers<[1], [0], [0], [1], [0, 0, 1, 1], [], []>} : vector<8x128xbf16>, vector<128x128xbf16>, vector<8x128xf32> -> vector<8x128xf32>
    %c0_31 = arith.constant 0 : index
    %91 = arith.index_cast %8 : i32 to index
    %c0_32 = arith.constant 0 : index
    %92 = vector.load %arg7[%c0_31, %91, %c0_32] : memref<1x8x128xf32, #tpu.memory_space<vmem>>, vector<1x8x128xf32>
    %93 = vector.shape_cast %92 : vector<1x8x128xf32> to vector<8x128xf32>
    %94 = vector.shape_cast %90 : vector<8x128xf32> to vector<1x8x128xf32>
    tpu.vector_store %arg7[%c0_31, %91, %c0_32], %94 {strides = array<i32>} : memref<1x8x128xf32, #tpu.memory_space<vmem>>, vector<1x8x128xf32>,
    %c0_i32_33 = arith.constant 0 : i32
    %95 = arith.cmpi eq, %c0_i32_5, %c0_i32_33 : i32
    %96 = arith.extui %95 : i1 to i32
    %c0_i32_34 = arith.constant 0 : i32
    %97 = arith.cmpi ne, %96, %c0_i32_34 : i32
    scf.if %97 {
      %100 = vector.extract_strided_slice %87 {offsets = [7, 0], sizes = [1, 128], strides = [1, 1]} : vector<8x128xf32> to vector<1x128xf32>
      %c0_38 = arith.constant 0 : index
      %c0_39 = arith.constant 0 : index
      %c0_40 = arith.constant 0 : index
      %101 = vector.load %arg8[%c0_38, %c0_39, %c0_40] : memref<1x1x128xf32, #tpu.memory_space<vmem>>, vector<1x1x128xf32>
      %102 = vector.shape_cast %101 : vector<1x1x128xf32> to vector<1x128xf32>
      %103 = vector.shape_cast %100 : vector<1x128xf32> to vector<1x1x128xf32>
      tpu.vector_store %arg8[%c0_38, %c0_39, %c0_40], %103 {strides = array<i32>} : memref<1x1x128xf32, #tpu.memory_space<vmem>>, vector<1x1x128xf32>,
    } else {
    }
    %98 = vector.extract_strided_slice %87 {offsets = [7, 0], sizes = [1, 128], strides = [1, 1]} : vector<8x128xf32> to vector<1x128xf32>
    %c1_i32_35 = arith.constant 1 : i32
    %c0_36 = arith.constant 0 : index
    %c0_37 = arith.constant 0 : index
    %99 = vector.load %arg9[%c0_36, %c0_37] : memref<1x128xf32, #tpu.memory_space<vmem>>, vector<1x128xf32>
    tpu.vector_store %arg9[%c0_36, %c0_37], %98 {strides = array<i32>} : memref<1x128xf32, #tpu.memory_space<vmem>>, vector<1x128xf32>,
    return
  }
  func.func @transform_0(%arg0: i32, %arg1: i32) -> (i32, i32, i32) {
    %c0_i32 = arith.constant 0 : i32
    %c0_i32_0 = arith.constant 0 : i32
    return %arg0, %arg1, %c0_i32 : i32, i32, i32
  }
  func.func @transform_1(%arg0: i32, %arg1: i32) -> (i32, i32) {
    %c0_i32 = arith.constant 0 : i32
    %c0_i32_0 = arith.constant 0 : i32
    %c0_i32_1 = arith.constant 0 : i32
    return %c0_i32, %c0_i32_0 : i32, i32
  }
  func.func @transform_2(%arg0: i32, %arg1: i32) -> (i32, i32) {
    %c0_i32 = arith.constant 0 : i32
    %c0_i32_0 = arith.constant 0 : i32
    %c0_i32_1 = arith.constant 0 : i32
    return %c0_i32, %c0_i32_0 : i32, i32
  }
  func.func @transform_3(%arg0: i32, %arg1: i32) -> (i32, i32, i32) {
    %c0_i32 = arith.constant 0 : i32
    %c0_i32_0 = arith.constant 0 : i32
    return %arg0, %arg1, %c0_i32 : i32, i32, i32
  }
  func.func @transform_4(%arg0: i32, %arg1: i32) -> (i32, i32, i32) {
    %c0_i32 = arith.constant 0 : i32
    %c0_i32_0 = arith.constant 0 : i32
    %c0_i32_1 = arith.constant 0 : i32
    return %arg0, %c0_i32, %c0_i32_0 : i32, i32, i32
  }
  func.func @transform_5(%arg0: i32, %arg1: i32) -> (i32, i32, i32) {
    %c0_i32 = arith.constant 0 : i32
    %c0_i32_0 = arith.constant 0 : i32
    return %arg0, %arg1, %c0_i32 : i32, i32, i32
  }
  func.func @transform_6(%arg0: i32, %arg1: i32) -> (i32, i32, i32) {
    %c0_i32 = arith.constant 0 : i32
    %c0_i32_0 = arith.constant 0 : i32
    %c0_i32_1 = arith.constant 0 : i32
    return %arg0, %c0_i32, %c0_i32_0 : i32, i32, i32
  }
}

</mosaic_0001>

<bundles_post_ra>
// kernel: tpu_custom_call.1
= control target key start
LH: loop header
LB: loop body
LE: loop exit
PB: predicated region body
PF: predicated region fallthrough
CT: control target
= control target key end

     0   :  { %s1488_s0 = inlined_call_operand.vmem [shape: bf16[2,16,4], index: 0, kind: input, shape index: {}]   ;;  %s1489_s1 = inlined_call_operand.vmem [shape: bf16[4,256], index: 1, kind: input, shape index: {}]   ;;  %s1490_s2 = inlined_call_operand.hbm [shape: bf16[128,128], index: 2, kind: input, shape index: {}]   ;;  %s1491_s3 = inlined_call_operand.vmem [shape: f32[2,16,1], index: 3, kind: input, shape index: {}]   ;;  %s1492_s4 = inlined_call_operand.vmem [shape: f32[2,1,128], index: 4, kind: input, shape index: {}]   ;;  %s1493_s5 = inlined_call_operand.hbm [shape: f32[2,16,128], index: 5, kind: output, shape index: {0}]   ;;  %s1494_s6 = inlined_call_operand.hbm [shape: f32[2,1,128], index: 6, kind: output, shape index: {1}]  }
   0x1   :  { %1511 = sst [smem:[#allocation24_spill]] %s1490_s2 }
   0x2   :  { %12 = vsyncpa [#allocation4], 0 }
   0x3   :  { %13 = vsyncpa [#allocation5], 0 }
   0x4   :  { %15 = vsyncpa [#allocation5 + $0x1], 0 }
   0x5   :  { %16 = vsyncpa [#allocation8], 0 }
   0x6   :  { %18 = vsyncpa [#allocation8 + $0x1], 0  ;;  %s1193_s21 = smov 0   ;;  %s1195_s22 = smov 0  }
   0x7   :  { %s1197_s23 = smov 0   ;;  %s1199_s24 = smov 0  }
   0x8   :  { %s1201_s25 = smov 0   ;;  %s1203_s26 = smov 0  }
   0x9   :  { %s1205_s27 = smov 0   ;;  %s1207_s28 = smov 0  }
   0xa   :  { %s1209_s29 = smov 0   ;;  %s1211_s30 = smov 0  }
   0xb   :  { %s1213_s7 = smov 0  }
   0xc LB: > { %1512 = sst [smem:[#allocation12_spill]] %s1108_s21  ;;  %s1495_s8 = sadd.s32 4294967295, %s1148_s7   ;;  %s1148_s7 = sphi %s1213_s7, %s24_s7   ;;  %s1144_s30 = sphi %s1211_s30, %s1559_s30   ;;  %s1140_s29 = sphi %s1209_s29, %s1553_s29   ;;  %s1136_s28 = sphi %s1207_s28, %s1552_s28   ;;  %s1132_s27 = sphi %s1205_s27, %s1551_s27   ;;  %s1128_s26 = sphi %s1203_s26, %s1550_s26   ;;  %s1124_s25 = sphi %s1201_s25, %s1558_s25   ;;  %s1120_s24 = sphi %s1199_s24, %s1557_s24   ;;  %s1116_s23 = sphi %s1197_s23, %s1548_s23   ;;  %s1112_s22 = sphi %s1195_s22, %s1556_s22   ;;  %s1108_s21 = sphi %s1193_s21, %s1555_s21  }
   0xd   : > { %1513 = sst [smem:[#allocation13_spill]] %s1116_s23  ;;  %s776_s9 = sadd.s32 4294967294, %s1148_s7  }
   0xe   : > { %1514 = sst [smem:[#allocation14_spill]] %s1120_s24  ;;  %s33_s10 = sadd.s32 1, %s1140_s29 }
   0xf   : > { %1515 = sst [smem:[#allocation15_spill]] %s1128_s26  ;;  %s36_s11 = sadd.s32 1, %s1144_s30 }
  0x10   : > { %1516 = sst [smem:[#allocation16_spill]] %s1140_s29  ;;  %p34_p0 = scmp.ge.s32.totalorder %s33_s10, 2 }
  0x11   : > { %1517 = sst [smem:[#allocation17_spill]] %s1144_s30  ;;  %s169_s12 = sadd.s32 1, %s1128_s26 }
  0x12   : > { %p179_p1 = scmp.ne.s32.totalorder %s1128_s26, %s1124_s25  ;;  %p1257_p2 = scmp.eq.s32.totalorder %s1495_s8, 3 }
  0x13   : > { %s1561_s10 = smov (%p34_p0, %s33_s10), 0  ;;  %s1563_s11 = smov (!%p34_p0, %s36_s11), %s1144_s30 }
  0x14   : > { %1519 = sst [smem:[#allocation18_spill]] %s1561_s10  ;;  %s165_s14 = ssub.s32 %s1140_s29, %s1561_s10 }
  0x15   : > { %p1268_p3 = por %p1257_p2, %p179_p1  ;;  %p38_p4 = scmp.ge.s32.totalorder %s1563_s11, 2 }
  0x16   : > { %p185_p5 = scmp.ne.s32.totalorder %s1124_s25, %s1120_s24  ;;  %p1274_p6 = scmp.eq.s32.totalorder %s776_s9, 3 }
  0x17   : > { %s1520_s15 = scalar_select %p1268_p3, 1, 0 }
  0x18   : > { %s195_s17 = sadd.s32 1, %s1116_s23  ;;  %s1565_s11 = smov (%p38_p4, %s1563_s11), 0 }
  0x19   : > { %1522 = sst [smem:[#allocation19_spill]] %s1565_s11  ;;  %p1283_p7 = por %p1274_p6, %p185_p5 }
  0x1a   : > { %p205_p8 = scmp.ne.s32.totalorder %s1116_s23, %s1112_s22  ;;  %s164_s19 = ssub.s32 %s1144_s30, %s1565_s11 }
  0x1b   : > { %s1523_s18 = scalar_select %p1283_p7, 1, 0 }
  0x1c   : > { %p211_p9 = scmp.ne.s32.totalorder %s1112_s22, %s1108_s21  ;;  %s166_s20 = sor.u32 %s165_s14, %s164_s19 }
  0x1d   : > { %1524 = sst [smem:[#allocation20_spill]] %s1523_s18  ;;  %p193_p10 = scmp.eq.s32.totalorder %s164_s19, 0 }
  0x1e   : > { %p167_p11 = scmp.eq.s32.totalorder %s166_s20, 0  ;;  %p1295_p12 = por %p205_p8, %p1257_p2 }
  0x1f   : > { %s1300_s8 = scalar_select %p193_p10, %s1116_s23, %s195_s17  }
  0x20   : > { %s1525_s9 = scalar_select %p1295_p12, 1, 0 }
  0x21   : > { %1526 = sst [smem:[#allocation21_spill]] %s1300_s8  ;;  %p1307_p13 = por %p211_p9, %p1274_p6 }
  0x22   : > { %s1303_s10 = scalar_select %p167_p11, %s1128_s26, %s169_s12  }
  0x23   : > { %s1528_s29 = scalar_select %p1307_p13, 1, 0 }
  0x24   : > { %1527 = sst [smem:[#allocation22_spill]] %s1303_s10  ;;  %p777_p0 = scmp.ge.s32.totalorder %s1148_s7, 1 }
  0x25   : > { %1529 = sst [smem:[#allocation23_spill]] %s1528_s29  ;;  %p219_p1 = scmp.lt.s32.totalorder %s1148_s7, 5 }
  0x26   : > { %s1530_s11 = sadd.s32 4294967295, %s1148_s7   ;;  %s1150_s12 = smov [#allocation3]  }
  0x27   : > { %p1315_p4 = scmp.eq.s32.totalorder %s1530_s11, 0  ;;  %p1319_p2 = pnand %p777_p0, %p219_p1 }
  0x28   : > { %s234_s17 = sshll.u32 %s1150_s12, 4  ;;  %s1534_s2 = sld [smem:[#allocation24_spill]]  ;;  %s235_s17 = int_to_ptr.vmem [resolvable:$true] %s234_s17 }
  0x29   : > { %s1531_s14 = scalar_select %p1315_p4, 1, 0 }
  0x2a   : > { %s1532_s13 = scalar_select %p1319_p2, 1, 0 }
  0x2b   : > { %p845_p5 = pneg %p1319_p2 }
  0x2d   : > { %p1327_p6 = pnand %p1315_p4, %p845_p5 }
  0x2e   : > { %s966_s20 = scalar_lea.hbm %s1534_s2, 1024 }
  0x2f   : > { %p967_p8 = scmp.ne.s32.totalorder %s1534_s2, %s966_s20  ;;  %p968_p9 = pneg %p1327_p6 }
  0x30   : > { %p973_p0 = scmp.lt.u32.totalorder %s966_s20, %s1534_s2 }
  0x31   : > { %p969_p10 = pnand %p968_p9, %p967_p8 }
  0x33   : > { %p970_p11 = pneg %p969_p10 }
  0x35   : > { %p975_p1 = pnand %p973_p0, %p970_p11 }
  0x37   : > { %978 = shalt.err (!%p975_p1)
}
  0x38   : > { %s979_s8 = scalar_lea.vmem %s235_s17, 1024  ;;  %p987_p3 = scmp.lt.s32.totalorder %s235_s17, %s235_s17 }
  0x39   : > { %p980_p5 = scmp.ne.s32.totalorder %s235_s17, %s979_s8  ;;  %p988_p12 = scmp.lt.s32.totalorder %s979_s8, %s979_s8 }
  0x3b   : > { %p982_p13 = pnand %p980_p5, %p968_p9  ;;  %p989_p4 = por %p988_p12, %p987_p3 }
  0x3d   : > { %p983_p7 = pneg %p982_p13 }
  0x3f   : > { %p990_p2 = pnand %p989_p4, %p983_p7 }
  0x41   : > { %993 = shalt.err (!%p990_p2)
}
  0x42   : > { %s1151_s30 = smov 64   ;;  %s1152_s10 = smov 4  }
  0x43   : > { %848 = dma.hbm_to_vmem [thread:$0]  (!%p1327_p6), %s1534_s2, 1024, %s235_s17, [#allocation4], %s1151_s30, %s1151_s30, %s1152_s10  }
  0x44   : > { %p1535_p8 = scmp.ne.s32.totalorder %s1532_s13, 0 }
  0x45   : > { %p1536_p10 = scmp.ne.s32.totalorder (!%p1535_p8), %s1531_s14, 0 }
  0x46   : > { %278 = sbr.rel (%p1535_p8) target bundleno = 602 (0x25a), region = 40 }
  0x4d   : > { %1095 = dma.done.wait (%p1536_p10), [#allocation4], 1024  }
  0x4e   : > { %1097 = vsyncadd (%p1536_p10), [#allocation4], 4294966272  ;;  %p326_p3 = scmp.lt.s32.totalorder %s1136_s28, 1  ;;  %p328_p7 = scmp.lt.s32.totalorder %s1132_s27, 1 }
  0x4f   : > { %s317_s26 = sand.u32 1, %s1124_s25   ;;  %s1537_s20 = sand.u32 1, %s1112_s22  }
  0x50   : > { %s327_s13 = scalar_select %p326_p3, %s1136_s28, 1 }
  0x51   : > { %s329_s17 = scalar_select %p328_p7, %s1132_s27, 1 }
  0x52   : > { %s783_s16 = sshll.u32 %s327_s13, 1  ;;  %s344_s14 = scalar_lea.vmem %s1492_s4, %s327_s13 }
  0x53   : > { %s331_s30 = sadd.s32 %s783_s16, %s329_s17  ;;  %s1364_s10 = sshll.u32 %s317_s26, 3  ;;  %v1372_v0 = vld [vmem:[%s344_s14] sm:$0x1] }
  0x54   : > { %s784_s11 = sshll.u32 %s331_s30, 2  ;;  %s786_s19 = sshll.u32 %s331_s30, 3 }
  0x55   : > { %s333_s29 = scalar_lea.vmem %s1488_s0, %s784_s11  ;;  %s341_s18 = scalar_lea.vmem %s1491_s3, %s786_s19 }
  0x56   : > { %s319_s24 = scalar_lea.vmem [#allocation6], %s1364_s10  ;;  %s1377_s13 = scalar_lea.vmem [#allocation7], %s1537_s20 }
  0x57   : > { %p787_p12 = scmp.ne.s32.totalorder %s1132_s27, 0 }
  0x58   : > { %351 = vst [vmem:[#allocation2] sm:$0x1] (!%p787_p12), %v1372_v0 }
  0x59   : > { %350 = sbr.rel (%p787_p12) target bundleno = 96 (0x60), region = 48 }
  0x60 PF: > { %v788_v1 = vld.sshfl [vmem:[%s1489_s1] sm:$0x33 pattern:$0x76325410]  ;;  %vm370_vm0 = vcmask 1041408   ;;  %v1153_v4 = vmov 0   ;;  %v352_v25 = vlaneseq }
  0x61   : > { %v365_v2 = vcombine.high %v788_v1, %v788_v1  ;;  %v372_v3 = vsel %vm370_vm0, %v788_v1, 0  ;;  %409 = vmatprep.mubr.bf16.mxu0 %v1153_v4  ;;  %953 = vset.pattern.permute.xlu0 %v1153_v4  ;;  %v424_v5 = vld [vmem:[%s341_s18] sm:$0xff]  ;;  %v1154_v7 = vmov 0.0   ;;  %vm366_vm2 = vcmask 31744   ;;  %v954_v10 = vld [vmem:[#allocation3] sm:$0xff]   ;;  %v957_v13 = vld [vmem:[#allocation3 + $0x18] sm:$0xff]  }
  0x62   : > { %v355_v6 = vld [vmem:[%s333_s29] sm:$0xf]  ;;  %vm425_vm1 = vcmp.ne.f32.partialorder %v424_v5, 0.0  ;;  %817 = vmatprep.subr.bf16.mxu1 %v1154_v7  ;;  %v958_v14 = vld [vmem:[#allocation3 + $0x20] sm:$0xff]   ;;  %vm1155_vm3 = vmmov 0   ;;  %v961_v17 = vld [vmem:[#allocation3 + $0x38] sm:$0xff]  }
  0x63   : > { %789 = vmatprep.subr.msk.bf16.mxu0 %vm370_vm0, %v365_v2  ;;  %v792_v8 = vsel %vm425_vm1, 1.0, %v1154_v7  ;;  %818 = vmatpush3.bf16.msra.mxu1 %v954_v10  ;;  %v955_v11 = vld [vmem:[#allocation3 + $0x8] sm:$0xff]   ;;  %v956_v12 = vld [vmem:[#allocation3 + $0x10] sm:$0xff]   ;;  %v353_v26 = vshrl.u32 %v352_v25, 7  ;;  %v793_v57 = vld [vmem:[#allocation2] ss:$0 sm:$0xff] }
  0x64   : > { %378 = vmatpush1.bf16.msra.mxu0 %v372_v3  ;;  %v429_v9 = vsub.f32 1.0, %v792_v8  ;;  %438 = vperm.xlu0 %953, %v792_v8   ;;  %v959_v15 = vld [vmem:[#allocation3 + $0x28] sm:$0xff]   ;;  %v960_v16 = vld [vmem:[#allocation3 + $0x30] sm:$0xff]   ;;  %s805_s2 = sshll.u32 %s1136_s28, 4  ;;  %s630_s21 = sshll.u32 %s1377_s13, 4  ;;  %s631_s21 = int_to_ptr.vmem [resolvable:$true] %s630_s21 }
  0x65   : > { %819 = vmatprep.subr.bf16.mxu1 %v1154_v7  ;;  %833 = vmatprep.mubr.msk.bf16.mxu1 %vm1155_vm3, %v1154_v7  ;;  %v445_v28 = vsub.s32 0, %v353_v26  ;;  %vm451_vm4 = vcmp.ge.s32.totalorder %v353_v26, 1  ;;  %vm461_vm5 = vcmp.ge.s32.totalorder %v353_v26, 2  ;;  %vm471_vm6 = vcmp.ge.s32.totalorder %v353_v26, 4  ;;  %s1391_s18 = scalar_lea.hbm %s1494_s6, %s805_s2  ;;  %s1538_s8 = sand.u32 1, %s1112_s22  }
  0x66   : > { %s603_s12 = scalar_lea.sflag [#allocation8], %s1538_s8  ;;  %s994_s14 = scalar_lea.vmem %s631_s21, 16 }
  0x67   : > { %790 = vmatmul.mubr.msk.bf16.vlgmr.msra.gmra.mrb[0].mxu0 %vm366_vm2, %v355_v6  ;;  %820 = vmatpush3.bf16.msra.mxu1 %v955_v11  ;;  %v446_v32 = vrot.slane %v1372_v0, %v445_v28  ;;  %p995_p13 = scmp.ne.s32.totalorder %s631_s21, %s994_s14  ;;  %p1539_p4 = scmp.ne.s32.totalorder %s1525_s9, 0 }
  0x68   : > { %432 = vperm.xlu0 %953, %v429_v9   ;;  %821 = vmatprep.subr.bf16.mxu1 %v1154_v7  ;;  %s1156_s30 = smov [#allocation7]  }
  0x69   : > { %p996_p2 = pnand %p995_p13, %p1539_p4  ;;  %s998_s11 = sshll.u32 %s1156_s30, 4  ;;  %s999_s11 = int_to_ptr.vmem [resolvable:$false] %s998_s11 }
  0x6a   : > { %s1000_s19 = scalar_lea.vmem %s999_s11, 32  ;;  %p1001_p9 = scmp.lt.s32.totalorder %s631_s21, %s999_s11 }
  0x6b   : > { %822 = vmatpush3.bf16.msra.mxu1 %v956_v12  ;;  %p997_p6 = pneg %p996_p2  ;;  %p1002_p11 = scmp.lt.s32.totalorder %s1000_s19, %s994_s14 }
  0x6c   : > { %823 = vmatprep.subr.bf16.mxu1 %v1154_v7 }
  0x6d   : > { %p1003_p0 = por %p1002_p11, %p1001_p9 }
  0x6f   : > { %824 = vmatpush3.bf16.msra.mxu1 %v957_v13  ;;  %p1004_p1 = pnand %p1003_p0, %p997_p6 }
  0x70   : > { %825 = vmatprep.subr.bf16.mxu1 %v1154_v7 }
  0x73   : > { %826 = vmatpush3.bf16.msra.mxu1 %v958_v14 }
  0x74   : > { %827 = vmatprep.subr.bf16.mxu1 %v1154_v7 }
  0x77   : > { %828 = vmatpush3.bf16.msra.mxu1 %v959_v15 }
  0x78   : > { %829 = vmatprep.subr.bf16.mxu1 %v1154_v7 }
  0x7b   : > { %830 = vmatpush3.bf16.msra.mxu1 %v960_v16 }
  0x7c   : > { %831 = vmatprep.subr.bf16.mxu1 %v1154_v7 }
  0x7f   : > { %832 = vmatpush3.bf16.msra.mxu1 %v961_v17 }
  0xe3   : > { %v439_v27 = vpop.permute.xlu0 %438 }
  0xe7   : > { %v433_v30 = vpop.permute.xlu0 %432 }
 0x13a   : > { %v411_v18 = vpop.f32.mrb[0].mxu0 }
 0x13b   : > { %v413_v19 = vpop.f32.mrb[1].mxu0 }
 0x13c   : > { %v791_v20 = vmul.f32 -1.442695, %v413_v19  ;;  %v415_v21 = vpop.f32.mrb[2].mxu0 }
 0x13d   : > { %v416_v22 = vpop.f32.mrb[3].mxu0 }
 0x13e   : > { %962 = vpow2.f32 %v791_v20 }
 0x148   : > { %v963_v23 = vpop.eup %962 }
 0x149   : > { %v421_v24 = vadd.f32 1.0, %v963_v23 }
 0x14b   : > { %964 = vrcp.f32 %v421_v24 }
 0x155   : > { %v965_v29 = vpop.eup %964 }
 0x156   : > { %v428_v31 = vsub.f32 1.0, %v965_v29  ;;  %v449_v33 = vmul.f32 %v965_v29, %v411_v18 }
 0x158   : > { %v441_v34 = vmul.f32 %v439_v27, %v428_v31  ;;  %v435_v35 = vmul.f32 %v433_v30, %v428_v31 }
 0x15a   : > { %v448_v36 = vmul.f32 %v446_v32, %v441_v34  ;;  %v452_v37 = vrot.slane %v435_v35, 7 }
 0x15c   : > { %v450_v38 = vadd.f32 %v449_v33, %v448_v36  ;;  %v455_v39 = vsel %vm451_vm4, %v452_v37, 1.0 }
 0x15d   : > { %v458_v40 = vmul.f32 %v455_v39, %v435_v35 }
 0x15e   : > { %v456_v41 = vrot.slane %v450_v38, 7 }
 0x15f   : > { %v462_v42 = vrot.slane %v458_v40, 6 }
 0x160   : > { %v457_v43 = vsel %vm451_vm4, %v456_v41, 0.0 }
 0x161   : > { %v459_v44 = vmul.f32 %v457_v43, %v435_v35  ;;  %v465_v45 = vsel %vm461_vm5, %v462_v42, 1.0 }
 0x162   : > { %v468_v46 = vmul.f32 %v465_v45, %v458_v40 }
 0x163   : > { %v460_v47 = vadd.f32 %v459_v44, %v450_v38 }
 0x164   : > { %v472_v49 = vrot.slane %v468_v46, 4 }
 0x165   : > { %v466_v48 = vrot.slane %v460_v47, 6 }
 0x166   : > { %v475_v53 = vsel %vm471_vm6, %v472_v49, 1.0 }
 0x167   : > { %v467_v50 = vsel %vm461_vm5, %v466_v48, 0.0  ;;  %v478_v55 = vmul.f32 %v475_v53, %v468_v46 }
 0x168   : > { %v469_v51 = vmul.f32 %v467_v50, %v458_v40 }
 0x169   : > { %v487_v60 = vmul.f32 %v793_v57, %v478_v55 }
 0x16a   : > { %v470_v52 = vadd.f32 %v469_v51, %v460_v47 }
 0x16c   : > { %v476_v54 = vrot.slane %v470_v52, 4 }
 0x16e   : > { %v477_v56 = vsel %vm471_vm6, %v476_v54, 0.0 }
 0x16f   : > { %v479_v58 = vmul.f32 %v477_v56, %v468_v46 }
 0x171   : > { %v480_v59 = vadd.f32 %v479_v58, %v470_v52 }
 0x173   : > { %v488_v61 = vadd.f32 %v487_v60, %v480_v59 }
 0x175   : > { %v489_v62 = vpack.c.bf16 %v488_v61, %v488_v61  ;;  %596 = vst [vmem:[#allocation2 - $0x7] sm:$0x80] %v488_v61  ;;  %595 = vst [vmem:[%s1377_s13 - $0x7] sm:$0x80] %v488_v61 }
 0x177   : > { %834 = vmatmul.mubr.bf16.vlgmr.msra.gmra.mrb[0].mxu1 %v489_v62 }
 0x178   : > { %1007 = shalt.err (!%p1004_p1)
}
 0x179   : > { %s1008_s20 = scalar_lea.hbm %s1391_s18, 16  ;;  %s1012_s16 = scalar_lea.hbm %s1494_s6, 32 }
 0x17a   : > { %p1009_p5 = scmp.ne.s32.totalorder %s1391_s18, %s1008_s20  ;;  %p1013_p3 = scmp.lt.u32.totalorder %s1391_s18, %s1494_s6 }
 0x17b   : > { %p1014_p7 = scmp.lt.u32.totalorder %s1012_s16, %s1008_s20  ;;  %p1016_p13 = scmp.lt.u32.totalorder %s1008_s20, %s1391_s18 }
 0x17c   : > { %p1010_p8 = pnand %p1009_p5, %p1539_p4 }
 0x17d   : > { %p1015_p12 = por %p1014_p7, %p1013_p3 }
 0x17e   : > { %p1011_p10 = pneg %p1010_p8 }
 0x17f   : > { %p1017_p2 = por %p1016_p13, %p1015_p12 }
 0x181   : > { %p1018_p6 = pnand %p1017_p2, %p1011_p10 }
 0x183   : > { %1021 = shalt.err (!%p1018_p6)
}
 0x184   : > { %842 = dma.vmem_to_hbm [thread:$0]  (%p1539_p4), %s631_s21, 16, %s1391_s18, %s603_s12  }
 0x185   : > { %s803_s29 = sshll.u32 %s1136_s28, 1  ;;  %s617_s30 = sshll.u32 %s319_s24, 4  ;;  %s1421_s30 = int_to_ptr.vmem [resolvable:$true] %s617_s30 }
 0x186   : > { %s613_s8 = sadd.s32 %s1132_s27, %s803_s29  ;;  %s598_s27 = scalar_lea.sflag [#allocation5], %s317_s26 }
 0x187   : > { %s804_s14 = sshll.u32 %s613_s8, 7  ;;  %s1022_s28 = scalar_lea.vmem %s1421_s30, 128 }
 0x188   : > { %s1419_s20 = scalar_lea.hbm %s1493_s5, %s804_s14  ;;  %p1023_p4 = scmp.ne.s32.totalorder %s1421_s30, %s1022_s28 }
 0x189   : > { %p1540_p9 = scmp.ne.s32.totalorder %s1520_s15, 0  ;;  %s1157_s9 = smov [#allocation6]  }
 0x18a   : > { %s1026_s21 = sshll.u32 %s1157_s9, 4  ;;  %s1027_s21 = int_to_ptr.vmem [resolvable:$false] %s1026_s21 }
 0x18b   : > { %p1024_p11 = pnand %p1023_p4, %p1540_p9  ;;  %s1028_s18 = scalar_lea.vmem %s1027_s21, 256 }
 0x18c   : > { %p1029_p1 = scmp.lt.s32.totalorder %s1421_s30, %s1027_s21  ;;  %p1030_p5 = scmp.lt.s32.totalorder %s1028_s18, %s1022_s28 }
 0x18d   : > { %p1025_p0 = pneg %p1024_p11 }
 0x18e   : > { %p1031_p8 = por %p1030_p5, %p1029_p1 }
 0x190   : > { %p1032_p10 = pnand %p1031_p8, %p1025_p0 }
 0x24a   : > { %v588_v63 = vpop.f32.mrb[0].mxu1 }
 0x24b   : > { %594 = vst [vmem:[%s319_s24] sm:$0xff] %v588_v63  ;;  %v835_v0 = vpop.f32.mrb[1].mxu1 }
 0x24c   : > { %v591_v1 = vpop.f32.mrb[2].mxu1 }
 0x24d   : > { %1035 = shalt.err (!%p1032_p10)
}
 0x24e   : > { %s1036_s24 = scalar_lea.hbm %s1419_s20, 128  ;;  %s1040_s12 = scalar_lea.hbm %s1493_s5, 512 }
 0x24f   : > { %p1037_p3 = scmp.ne.s32.totalorder %s1419_s20, %s1036_s24  ;;  %p1041_p13 = scmp.lt.u32.totalorder %s1419_s20, %s1493_s5 }
 0x250   : > { %p1042_p2 = scmp.lt.u32.totalorder %s1040_s12, %s1036_s24  ;;  %p1044_p4 = scmp.lt.u32.totalorder %s1036_s24, %s1419_s20 }
 0x251   : > { %p1038_p7 = pnand %p1037_p3, %p1540_p9 }
 0x252   : > { %p1043_p6 = por %p1042_p2, %p1041_p13 }
 0x253   : > { %p1039_p12 = pneg %p1038_p7 }
 0x254   : > { %p1045_p11 = por %p1044_p4, %p1043_p6 }
 0x256   : > { %p1046_p0 = pnand %p1045_p11, %p1039_p12 }
 0x258   : > { %1049 = shalt.err (!%p1046_p0)
}
 0x259   : > { %841 = dma.vmem_to_hbm [thread:$0]  (%p1540_p9), %s1421_s30, 128, %s1419_s20, %s598_s27   ;;  %v836_v2 = vpop.f32.mrb[3].mxu1 }
 0x25a PF: > { %s1541_s16 = sld [smem:[#allocation14_spill]]  ;;  %s1542_s2 = sld [smem:[#allocation20_spill]] }
 0x25b   : > { %p858_p1 = scmp.ge.s32.totalorder %s1148_s7, 2 }
 0x260   : > { %s642_s23 = sand.u32 1, %s1541_s16   ;;  %p1543_p5 = scmp.ne.s32.totalorder %s1542_s2, 0 }
 0x261   : > { %s643_s29 = scalar_lea.sflag [#allocation5], %s642_s23 }
 0x262   : > { %p850_p8 = pnand %p858_p1, %p1543_p5 }
 0x264   : > { %1099 = dma.done.wait (!%p850_p8), %s643_s29, 128  }
 0x265   : > { %1101 = vsyncadd (!%p850_p8), %s643_s29, 4294967168  ;;  %s1544_s8 = sld [smem:[#allocation12_spill]]  ;;  %s1545_s14 = sld [smem:[#allocation23_spill]] }
 0x26b   : > { %s651_s11 = sand.u32 1, %s1544_s8   ;;  %p1546_p10 = scmp.ne.s32.totalorder %s1545_s14, 0 }
 0x26c   : > { %s652_s15 = scalar_lea.sflag [#allocation8], %s651_s11 }
 0x26d   : > { %p853_p3 = pnand %p858_p1, %p1546_p10 }
 0x26f   : > { %1103 = dma.done.wait (!%p853_p3), %s652_s15, 16  }
 0x270   : > { %1105 = vsyncadd (!%p853_p3), %s652_s15, 4294967280  ;;  %s24_s7 = sadd.s32 1, %s1148_s7   ;;  %s1547_s30 = sld [smem:[#allocation13_spill]] }
 0x271   : > { %p21_p9 = scmp.ge.s32.totalorder %s24_s7, 6   ;;  %s1548_s23 = sld [smem:[#allocation21_spill]] }
 0x272   : > { %s1549_s19 = sld [smem:[#allocation15_spill]]  ;;  %s1550_s26 = sld [smem:[#allocation22_spill]] }
 0x273   : > { %s1551_s27 = sld [smem:[#allocation16_spill]]  ;;  %s1552_s28 = sld [smem:[#allocation17_spill]] }
 0x274   : > { %s1553_s29 = sld [smem:[#allocation18_spill]]  ;;  %s1554_s20 = sld [smem:[#allocation19_spill]] }
 0x275   : > { %s1555_s21 = smov %s1112_s22  ;;  %s1557_s24 = smov %s1124_s25 }
 0x276   : > { %s1556_s22 = smov %s1547_s30  ;;  %23 = sbr.rel (!%p21_p9) target bundleno = 12 (0xc), region = 107 }
 0x278   : > { %s1558_s25 = smov %s1549_s19 }
 0x27a   : > { %s1559_s30 = smov %s1554_s20 }
 0x27d   :  { %656 = vsyncpa [#allocation4], 1 }
 0x27e   :  { %658 = vsyncpa [#allocation4 + $0x1], 1 }
 0x27f   :  { %659 = vsyncpa [#allocation5], 1 }
 0x280   :  { %661 = vsyncpa [#allocation5 + $0x1], 1 }
 0x281   :  { %662 = vsyncpa [#allocation8], 1 }
 0x282   :  { %664 = vsyncpa [#allocation8 + $0x1], 1 }

</bundles_post_ra>
